<compile_context>
chip_gen: v7x
topology: tpu7x:2x2x1
jax: 0.10.0
libtpu: 0.0.40
codegen_flags: <defaults>
</compile_context>

<pallas_src>
import functools

import jax
import jax.numpy as jnp
from jax import lax
from jax.experimental import pallas as pl
from jax.experimental.pallas import tpu as pltpu


# ----------------------------- Pallas kernel ------------------------------- #
def textclr_kernel(xw_ref, whh_ref, w1_ref, b1_ref, w2_ref, b2_ref, out_ref,
                   *, apply_softmax: bool, num_classes: int, num_sub: int):
    """Elman recurrence + fc1(ReLU) + fc2 (+ optional softmax), one batch block.

    xw_ref  : (T, BB, H) f32  time-major pre-projected inputs (emb@W_ih + b_rnn)
    whh_ref : (H, H)     bf16 hidden->hidden weights (transposed vs torch)
    w1_ref  : (H, H)  bf16, b1_ref: (1, H) f32
    w2_ref  : (H, Cp) bf16 (classes zero-padded to Cp lanes), b2_ref: (1, Cp) f32
    out_ref : (BB, Cp)   f32
    """
    T, BB, H = xw_ref.shape
    SB = BB // num_sub                      # rows per independent sub-chain

    w_hh = whh_ref[...]                     # (H, H) bf16, VMEM-resident

    # ---- Elman recurrence: T static steps, NS independent sub-chains -------
    # Independent chains per timestep let the scheduler overlap one chain's
    # MXU matmul with another chain's EUP tanh (serial chain otherwise).
    # h kept in f32 (safe on v5e); cast to bf16 only at the matmul operand.
    hs = [jnp.zeros((SB, H), jnp.float32) for _ in range(num_sub)]
    for t in range(T):
        xw_t = xw_ref[t]                    # (BB, H) f32, contiguous load
        for s in range(num_sub):
            pre = xw_t[s * SB:(s + 1) * SB, :] + jnp.dot(
                hs[s].astype(w_hh.dtype), w_hh,
                preferred_element_type=jnp.float32)
            hs[s] = jnp.tanh(pre)           # == rnn_out[:, -1, :] at t == T-1

    h = jnp.concatenate(hs, axis=0)         # (BB, H) f32

    # TODO(synk): F.dropout(p=0.5, training=True) in the PyTorch reference is
    #             stochastic; omitted -> deterministic (eval-mode) path.
    hid = jnp.dot(h.astype(w1_ref.dtype), w1_ref[...],
                  preferred_element_type=jnp.float32) + b1_ref[...]
    hid = jnp.maximum(hid, 0.0)             # ReLU(fc1)

    logits = jnp.dot(hid.astype(w2_ref.dtype), w2_ref[...],
                     preferred_element_type=jnp.float32) + b2_ref[...]

    if apply_softmax:
        # Mask the zero-padded class lanes so they don't perturb the softmax.
        col = lax.broadcasted_iota(jnp.int32, logits.shape, 1)
        logits = jnp.where(col < num_classes, logits, -1e30)
        m = jnp.max(logits, axis=1, keepdims=True)
        e = jnp.exp(logits - m)
        denom = jnp.sum(e, axis=1, keepdims=True)
        logits = e * pl.reciprocal(denom, approx=True)   # EUP divide

    out_ref[...] = logits.astype(out_ref.dtype)


# ------------------------------ JAX wrapper -------------------------------- #
def _round_up(x, m):
    return (x + m - 1) // m * m


def textclr_forward(token_ids, params, apply_softmax=False, block_b=256):
    """token_ids: (B, T) int32. Returns (B, num_classes) float32."""
    B, T = token_ids.shape
    H = params["w_hh"].shape[0]
    C = params["w2"].shape[1]

    # Batch blocking: each block splits into NS sub-chains of >=8 rows each,
    # and we force at least two blocks so both TensorCores on v7x get work.
    NS = 2                      # interleaved sub-chains in the recurrence
    unit = NS * 8               # minimum batch block (sublane granule per chain)
    BB = max(unit, (min(block_b, _round_up(B, unit)) // unit) * unit)
    B_pad = _round_up(B, BB)
    if B_pad // BB < 2:         # >= 2 grid steps -> megacore sharding on v7x
        B_pad = 2 * BB
    if B_pad != B:
        token_ids = jnp.pad(token_ids, ((0, B_pad - B), (0, 0)))  # pads with idx 0

    # Class padding to a full 128-lane output tile (lane-dense store).
    C_pad = _round_up(C, 128)
    w2 = jnp.pad(params["w2"], ((0, 0), (0, C_pad - C))).astype(jnp.bfloat16)
    b2 = jnp.pad(params["b2"], ((0, 0), (0, C_pad - C))).astype(jnp.float32)

    # Fold the embedding into the RNN input projection: one (V, H) table,
    # gathered per token -> the kernel never sees E and skips a whole matmul.
    # TODO(synk): scalar-prefetch token_ids and gather the (V, H) table
    #             in-kernel to drop the (T, B, H) HBM round trip entirely.
    emb_proj = (params["emb"] @ params["w_ih"] + params["b_rnn"]).astype(jnp.float32)
    xw = jnp.take(emb_proj, token_ids.T, axis=0)          # (T, B_pad, H) time-major

    # bf16 MXU operands, f32 biases / accumulation.
    w_hh = params["w_hh"].astype(jnp.bfloat16)
    w1 = params["w1"].astype(jnp.bfloat16)
    b1 = params["b1"].astype(jnp.float32)

    kernel = functools.partial(textclr_kernel, apply_softmax=apply_softmax,
                               num_classes=C, num_sub=NS)

    const2 = lambda b: (0, 0)   # weights: same block every grid step -> resident
    out = pl.pallas_call(
        kernel,
        out_shape=jax.ShapeDtypeStruct((B_pad, C_pad), jnp.float32),
        grid=(B_pad // BB,),
        in_specs=[
            pl.BlockSpec((T, BB, H), lambda b: (0, b, 0)),   # batch-tiled, time-major
            pl.BlockSpec((H, H), const2),
            pl.BlockSpec((H, H), const2),
            pl.BlockSpec((1, H), const2),
            pl.BlockSpec((H, C_pad), const2),
            pl.BlockSpec((1, C_pad), const2),
        ],
        out_specs=pl.BlockSpec((BB, C_pad), lambda b: (b, 0)),
        compiler_params=pltpu.CompilerParams(
            dimension_semantics=("parallel",),               # shard batch across TCs
            vmem_limit_bytes=32 * 1024 * 1024,
        ),
    )(xw, w_hh, w1, b1, w2, b2)

    return out[:B, :C]


# ------------------------- deterministic parameters ------------------------ #
def make_params(key, num_embeddings, embedding_dim, rnn_hidden_size, num_classes,
                padding_idx=0):
    ks = jax.random.split(key, 8)
    scale = 0.1
    emb = scale * jax.random.normal(ks[0], (num_embeddings, embedding_dim), jnp.float32)
    emb = emb.at[padding_idx].set(0.0)  # padding_idx row is zero, like nn.Embedding
    return {
        "emb":   emb,
        "w_ih":  scale * jax.random.normal(ks[1], (embedding_dim, rnn_hidden_size), jnp.float32),
        "w_hh":  scale * jax.random.normal(ks[2], (rnn_hidden_size, rnn_hidden_size), jnp.float32),
        "b_rnn": scale * jax.random.normal(ks[3], (1, rnn_hidden_size), jnp.float32),
        "w1":    scale * jax.random.normal(ks[4], (rnn_hidden_size, rnn_hidden_size), jnp.float32),
        "b1":    scale * jax.random.normal(ks[5], (1, rnn_hidden_size), jnp.float32),
        "w2":    scale * jax.random.normal(ks[6], (rnn_hidden_size, num_classes), jnp.float32),
        "b2":    scale * jax.random.normal(ks[7], (1, num_classes), jnp.float32),
    }


# --------------------------- pure-JAX reference ----------------------------- #
def textclr_reference(token_ids, params, apply_softmax=False):
    x = jnp.take(params["emb"], token_ids, axis=0)  # (B, T, E), f32
    B, T, _ = x.shape
    H = params["w_hh"].shape[0]
    h = jnp.zeros((B, H), jnp.float32)
    for t in range(T):
        h = jnp.tanh(x[:, t, :] @ params["w_ih"] + h @ params["w_hh"] + params["b_rnn"])
    hid = jnp.maximum(h @ params["w1"] + params["b1"], 0.0)
    logits = hid @ params["w2"] + params["b2"]
    if apply_softmax:
        logits = jax.nn.softmax(logits, axis=1)
    return logits


if __name__ == "__main__":
    # Small shapes consistent with the module's forward.
    num_embeddings = 16   # vocabulary size
    embedding_dim = 32
    rnn_hidden_size = 32
    num_classes = 4
    batch = 2
    seq_len = 8

    key = jax.random.PRNGKey(0)
    k_param, k_tok = jax.random.split(key)

    params = make_params(k_param, num_embeddings, embedding_dim,
                         rnn_hidden_size, num_classes, padding_idx=0)
    token_ids = jax.random.randint(k_tok, (batch, seq_len), 0, num_embeddings,
                                   dtype=jnp.int32)

    # Logits path.
    out = jax.block_until_ready(textclr_forward(token_ids, params, apply_softmax=False))
    ref = textclr_reference(token_ids, params, apply_softmax=False)
    assert out.shape == (batch, num_classes)
    # bf16 MXU operands (f32 accumulation) -> relaxed tolerance vs f32 reference.
    assert jnp.allclose(out, ref, atol=2e-2, rtol=2e-2), "logits mismatch vs JAX reference"

    # Softmax path.
    out_sm = jax.block_until_ready(textclr_forward(token_ids, params, apply_softmax=True))
    ref_sm = textclr_reference(token_ids, params, apply_softmax=True)
    assert jnp.allclose(out_sm, ref_sm, atol=2e-2, rtol=2e-2), "softmax mismatch vs JAX reference"

    print("KERNEL_OK")
</pallas_src>

<mosaic_0001>
module attributes {stable_mosaic.version = 11 : i64} {
  func.func @textclr_kernel(%arg0: i32, %arg1: memref<8x16x32xf32, #tpu.memory_space<vmem>>, %arg2: memref<32x32xbf16, #tpu.memory_space<vmem>>, %arg3: memref<32x32xbf16, #tpu.memory_space<vmem>>, %arg4: memref<1x32xf32, #tpu.memory_space<vmem>>, %arg5: memref<32x128xbf16, #tpu.memory_space<vmem>>, %arg6: memref<1x128xf32, #tpu.memory_space<vmem>>, %arg7: memref<16x128xf32, #tpu.memory_space<vmem>>) attributes {dimension_semantics = [#tpu.dimension_semantics<parallel>], iteration_bounds = array<i64: 2>, scalar_prefetch = 0 : i64, scratch_operands = 0 : i64, tpu.core_type = #tpu.core_type<tc>, window_params = [{transform_indices = @transform_0, window_bounds = array<i64: 8, 16, 32>}, {pipeline_mode = #tpu.pipeline_mode<synchronous>, transform_indices = @transform_1, window_bounds = array<i64: 32, 32>}, {pipeline_mode = #tpu.pipeline_mode<synchronous>, transform_indices = @transform_2, window_bounds = array<i64: 32, 32>}, {pipeline_mode = #tpu.pipeline_mode<synchronous>, transform_indices = @transform_3, window_bounds = array<i64: 1, 32>}, {pipeline_mode = #tpu.pipeline_mode<synchronous>, transform_indices = @transform_4, window_bounds = array<i64: 32, 128>}, {pipeline_mode = #tpu.pipeline_mode<synchronous>, transform_indices = @transform_5, window_bounds = array<i64: 1, 128>}, {transform_indices = @transform_6, window_bounds = array<i64: 16, 128>}]} {
    %c0 = arith.constant 0 : index
    %c0_0 = arith.constant 0 : index
    %0 = vector.load %arg2[%c0, %c0_0] : memref<32x32xbf16, #tpu.memory_space<vmem>>, vector<32x32xbf16>
    %cst = arith.constant 0.000000e+00 : f32
    %1 = vector.broadcast %cst : f32 to vector<8x32xf32>
    %cst_1 = arith.constant 0.000000e+00 : f32
    %2 = vector.broadcast %cst_1 : f32 to vector<8x32xf32>
    %c0_2 = arith.constant 0 : index
    %c0_3 = arith.constant 0 : index
    %c0_4 = arith.constant 0 : index
    %3 = vector.load %arg1[%c0_2, %c0_3, %c0_4] : memref<8x16x32xf32, #tpu.memory_space<vmem>>, vector<1x16x32xf32>
    %4 = vector.shape_cast %3 : vector<1x16x32xf32> to vector<16x32xf32>
    %5 = vector.extract_strided_slice %4 {offsets = [0, 0], sizes = [8, 32], strides = [1, 1]} : vector<16x32xf32> to vector<8x32xf32>
    %6 = arith.truncf %1 : vector<8x32xf32> to vector<8x32xbf16>
    %cst_5 = arith.constant dense<0.000000e+00> : vector<8x32xf32>
    %7 = tpu.matmul %6, %0, %cst_5 {dimension_numbers = #tpu.dot_dimension_numbers<[1], [0], [0], [1], [0, 0, 1, 1], [], []>} : vector<8x32xbf16>, vector<32x32xbf16>, vector<8x32xf32> -> vector<8x32xf32>
    %8 = arith.addf %5, %7 : vector<8x32xf32>
    %9 = math.tanh %8 : vector<8x32xf32>
    %10 = vector.extract_strided_slice %4 {offsets = [8, 0], sizes = [8, 32], strides = [1, 1]} : vector<16x32xf32> to vector<8x32xf32>
    %11 = arith.truncf %2 : vector<8x32xf32> to vector<8x32xbf16>
    %cst_6 = arith.constant dense<0.000000e+00> : vector<8x32xf32>
    %12 = tpu.matmul %11, %0, %cst_6 {dimension_numbers = #tpu.dot_dimension_numbers<[1], [0], [0], [1], [0, 0, 1, 1], [], []>} : vector<8x32xbf16>, vector<32x32xbf16>, vector<8x32xf32> -> vector<8x32xf32>
    %13 = arith.addf %10, %12 : vector<8x32xf32>
    %14 = math.tanh %13 : vector<8x32xf32>
    %c1 = arith.constant 1 : index
    %c0_7 = arith.constant 0 : index
    %c0_8 = arith.constant 0 : index
    %15 = vector.load %arg1[%c1, %c0_7, %c0_8] : memref<8x16x32xf32, #tpu.memory_space<vmem>>, vector<1x16x32xf32>
    %16 = vector.shape_cast %15 : vector<1x16x32xf32> to vector<16x32xf32>
    %17 = vector.extract_strided_slice %16 {offsets = [0, 0], sizes = [8, 32], strides = [1, 1]} : vector<16x32xf32> to vector<8x32xf32>
    %18 = arith.truncf %9 : vector<8x32xf32> to vector<8x32xbf16>
    %cst_9 = arith.constant dense<0.000000e+00> : vector<8x32xf32>
    %19 = tpu.matmul %18, %0, %cst_9 {dimension_numbers = #tpu.dot_dimension_numbers<[1], [0], [0], [1], [0, 0, 1, 1], [], []>} : vector<8x32xbf16>, vector<32x32xbf16>, vector<8x32xf32> -> vector<8x32xf32>
    %20 = arith.addf %17, %19 : vector<8x32xf32>
    %21 = math.tanh %20 : vector<8x32xf32>
    %22 = vector.extract_strided_slice %16 {offsets = [8, 0], sizes = [8, 32], strides = [1, 1]} : vector<16x32xf32> to vector<8x32xf32>
    %23 = arith.truncf %14 : vector<8x32xf32> to vector<8x32xbf16>
    %cst_10 = arith.constant dense<0.000000e+00> : vector<8x32xf32>
    %24 = tpu.matmul %23, %0, %cst_10 {dimension_numbers = #tpu.dot_dimension_numbers<[1], [0], [0], [1], [0, 0, 1, 1], [], []>} : vector<8x32xbf16>, vector<32x32xbf16>, vector<8x32xf32> -> vector<8x32xf32>
    %25 = arith.addf %22, %24 : vector<8x32xf32>
    %26 = math.tanh %25 : vector<8x32xf32>
    %c2 = arith.constant 2 : index
    %c0_11 = arith.constant 0 : index
    %c0_12 = arith.constant 0 : index
    %27 = vector.load %arg1[%c2, %c0_11, %c0_12] : memref<8x16x32xf32, #tpu.memory_space<vmem>>, vector<1x16x32xf32>
    %28 = vector.shape_cast %27 : vector<1x16x32xf32> to vector<16x32xf32>
    %29 = vector.extract_strided_slice %28 {offsets = [0, 0], sizes = [8, 32], strides = [1, 1]} : vector<16x32xf32> to vector<8x32xf32>
    %30 = arith.truncf %21 : vector<8x32xf32> to vector<8x32xbf16>
    %cst_13 = arith.constant dense<0.000000e+00> : vector<8x32xf32>
    %31 = tpu.matmul %30, %0, %cst_13 {dimension_numbers = #tpu.dot_dimension_numbers<[1], [0], [0], [1], [0, 0, 1, 1], [], []>} : vector<8x32xbf16>, vector<32x32xbf16>, vector<8x32xf32> -> vector<8x32xf32>
    %32 = arith.addf %29, %31 : vector<8x32xf32>
    %33 = math.tanh %32 : vector<8x32xf32>
    %34 = vector.extract_strided_slice %28 {offsets = [8, 0], sizes = [8, 32], strides = [1, 1]} : vector<16x32xf32> to vector<8x32xf32>
    %35 = arith.truncf %26 : vector<8x32xf32> to vector<8x32xbf16>
    %cst_14 = arith.constant dense<0.000000e+00> : vector<8x32xf32>
    %36 = tpu.matmul %35, %0, %cst_14 {dimension_numbers = #tpu.dot_dimension_numbers<[1], [0], [0], [1], [0, 0, 1, 1], [], []>} : vector<8x32xbf16>, vector<32x32xbf16>, vector<8x32xf32> -> vector<8x32xf32>
    %37 = arith.addf %34, %36 : vector<8x32xf32>
    %38 = math.tanh %37 : vector<8x32xf32>
    %c3 = arith.constant 3 : index
    %c0_15 = arith.constant 0 : index
    %c0_16 = arith.constant 0 : index
    %39 = vector.load %arg1[%c3, %c0_15, %c0_16] : memref<8x16x32xf32, #tpu.memory_space<vmem>>, vector<1x16x32xf32>
    %40 = vector.shape_cast %39 : vector<1x16x32xf32> to vector<16x32xf32>
    %41 = vector.extract_strided_slice %40 {offsets = [0, 0], sizes = [8, 32], strides = [1, 1]} : vector<16x32xf32> to vector<8x32xf32>
    %42 = arith.truncf %33 : vector<8x32xf32> to vector<8x32xbf16>
    %cst_17 = arith.constant dense<0.000000e+00> : vector<8x32xf32>
    %43 = tpu.matmul %42, %0, %cst_17 {dimension_numbers = #tpu.dot_dimension_numbers<[1], [0], [0], [1], [0, 0, 1, 1], [], []>} : vector<8x32xbf16>, vector<32x32xbf16>, vector<8x32xf32> -> vector<8x32xf32>
    %44 = arith.addf %41, %43 : vector<8x32xf32>
    %45 = math.tanh %44 : vector<8x32xf32>
    %46 = vector.extract_strided_slice %40 {offsets = [8, 0], sizes = [8, 32], strides = [1, 1]} : vector<16x32xf32> to vector<8x32xf32>
    %47 = arith.truncf %38 : vector<8x32xf32> to vector<8x32xbf16>
    %cst_18 = arith.constant dense<0.000000e+00> : vector<8x32xf32>
    %48 = tpu.matmul %47, %0, %cst_18 {dimension_numbers = #tpu.dot_dimension_numbers<[1], [0], [0], [1], [0, 0, 1, 1], [], []>} : vector<8x32xbf16>, vector<32x32xbf16>, vector<8x32xf32> -> vector<8x32xf32>
    %49 = arith.addf %46, %48 : vector<8x32xf32>
    %50 = math.tanh %49 : vector<8x32xf32>
    %c4 = arith.constant 4 : index
    %c0_19 = arith.constant 0 : index
    %c0_20 = arith.constant 0 : index
    %51 = vector.load %arg1[%c4, %c0_19, %c0_20] : memref<8x16x32xf32, #tpu.memory_space<vmem>>, vector<1x16x32xf32>
    %52 = vector.shape_cast %51 : vector<1x16x32xf32> to vector<16x32xf32>
    %53 = vector.extract_strided_slice %52 {offsets = [0, 0], sizes = [8, 32], strides = [1, 1]} : vector<16x32xf32> to vector<8x32xf32>
    %54 = arith.truncf %45 : vector<8x32xf32> to vector<8x32xbf16>
    %cst_21 = arith.constant dense<0.000000e+00> : vector<8x32xf32>
    %55 = tpu.matmul %54, %0, %cst_21 {dimension_numbers = #tpu.dot_dimension_numbers<[1], [0], [0], [1], [0, 0, 1, 1], [], []>} : vector<8x32xbf16>, vector<32x32xbf16>, vector<8x32xf32> -> vector<8x32xf32>
    %56 = arith.addf %53, %55 : vector<8x32xf32>
    %57 = math.tanh %56 : vector<8x32xf32>
    %58 = vector.extract_strided_slice %52 {offsets = [8, 0], sizes = [8, 32], strides = [1, 1]} : vector<16x32xf32> to vector<8x32xf32>
    %59 = arith.truncf %50 : vector<8x32xf32> to vector<8x32xbf16>
    %cst_22 = arith.constant dense<0.000000e+00> : vector<8x32xf32>
    %60 = tpu.matmul %59, %0, %cst_22 {dimension_numbers = #tpu.dot_dimension_numbers<[1], [0], [0], [1], [0, 0, 1, 1], [], []>} : vector<8x32xbf16>, vector<32x32xbf16>, vector<8x32xf32> -> vector<8x32xf32>
    %61 = arith.addf %58, %60 : vector<8x32xf32>
    %62 = math.tanh %61 : vector<8x32xf32>
    %c5 = arith.constant 5 : index
    %c0_23 = arith.constant 0 : index
    %c0_24 = arith.constant 0 : index
    %63 = vector.load %arg1[%c5, %c0_23, %c0_24] : memref<8x16x32xf32, #tpu.memory_space<vmem>>, vector<1x16x32xf32>
    %64 = vector.shape_cast %63 : vector<1x16x32xf32> to vector<16x32xf32>
    %65 = vector.extract_strided_slice %64 {offsets = [0, 0], sizes = [8, 32], strides = [1, 1]} : vector<16x32xf32> to vector<8x32xf32>
    %66 = arith.truncf %57 : vector<8x32xf32> to vector<8x32xbf16>
    %cst_25 = arith.constant dense<0.000000e+00> : vector<8x32xf32>
    %67 = tpu.matmul %66, %0, %cst_25 {dimension_numbers = #tpu.dot_dimension_numbers<[1], [0], [0], [1], [0, 0, 1, 1], [], []>} : vector<8x32xbf16>, vector<32x32xbf16>, vector<8x32xf32> -> vector<8x32xf32>
    %68 = arith.addf %65, %67 : vector<8x32xf32>
    %69 = math.tanh %68 : vector<8x32xf32>
    %70 = vector.extract_strided_slice %64 {offsets = [8, 0], sizes = [8, 32], strides = [1, 1]} : vector<16x32xf32> to vector<8x32xf32>
    %71 = arith.truncf %62 : vector<8x32xf32> to vector<8x32xbf16>
    %cst_26 = arith.constant dense<0.000000e+00> : vector<8x32xf32>
    %72 = tpu.matmul %71, %0, %cst_26 {dimension_numbers = #tpu.dot_dimension_numbers<[1], [0], [0], [1], [0, 0, 1, 1], [], []>} : vector<8x32xbf16>, vector<32x32xbf16>, vector<8x32xf32> -> vector<8x32xf32>
    %73 = arith.addf %70, %72 : vector<8x32xf32>
    %74 = math.tanh %73 : vector<8x32xf32>
    %c6 = arith.constant 6 : index
    %c0_27 = arith.constant 0 : index
    %c0_28 = arith.constant 0 : index
    %75 = vector.load %arg1[%c6, %c0_27, %c0_28] : memref<8x16x32xf32, #tpu.memory_space<vmem>>, vector<1x16x32xf32>
    %76 = vector.shape_cast %75 : vector<1x16x32xf32> to vector<16x32xf32>
    %77 = vector.extract_strided_slice %76 {offsets = [0, 0], sizes = [8, 32], strides = [1, 1]} : vector<16x32xf32> to vector<8x32xf32>
    %78 = arith.truncf %69 : vector<8x32xf32> to vector<8x32xbf16>
    %cst_29 = arith.constant dense<0.000000e+00> : vector<8x32xf32>
    %79 = tpu.matmul %78, %0, %cst_29 {dimension_numbers = #tpu.dot_dimension_numbers<[1], [0], [0], [1], [0, 0, 1, 1], [], []>} : vector<8x32xbf16>, vector<32x32xbf16>, vector<8x32xf32> -> vector<8x32xf32>
    %80 = arith.addf %77, %79 : vector<8x32xf32>
    %81 = math.tanh %80 : vector<8x32xf32>
    %82 = vector.extract_strided_slice %76 {offsets = [8, 0], sizes = [8, 32], strides = [1, 1]} : vector<16x32xf32> to vector<8x32xf32>
    %83 = arith.truncf %74 : vector<8x32xf32> to vector<8x32xbf16>
    %cst_30 = arith.constant dense<0.000000e+00> : vector<8x32xf32>
    %84 = tpu.matmul %83, %0, %cst_30 {dimension_numbers = #tpu.dot_dimension_numbers<[1], [0], [0], [1], [0, 0, 1, 1], [], []>} : vector<8x32xbf16>, vector<32x32xbf16>, vector<8x32xf32> -> vector<8x32xf32>
    %85 = arith.addf %82, %84 : vector<8x32xf32>
    %86 = math.tanh %85 : vector<8x32xf32>
    %c7 = arith.constant 7 : index
    %c0_31 = arith.constant 0 : index
    %c0_32 = arith.constant 0 : index
    %87 = vector.load %arg1[%c7, %c0_31, %c0_32] : memref<8x16x32xf32, #tpu.memory_space<vmem>>, vector<1x16x32xf32>
    %88 = vector.shape_cast %87 : vector<1x16x32xf32> to vector<16x32xf32>
    %89 = vector.extract_strided_slice %88 {offsets = [0, 0], sizes = [8, 32], strides = [1, 1]} : vector<16x32xf32> to vector<8x32xf32>
    %90 = arith.truncf %81 : vector<8x32xf32> to vector<8x32xbf16>
    %cst_33 = arith.constant dense<0.000000e+00> : vector<8x32xf32>
    %91 = tpu.matmul %90, %0, %cst_33 {dimension_numbers = #tpu.dot_dimension_numbers<[1], [0], [0], [1], [0, 0, 1, 1], [], []>} : vector<8x32xbf16>, vector<32x32xbf16>, vector<8x32xf32> -> vector<8x32xf32>
    %92 = arith.addf %89, %91 : vector<8x32xf32>
    %93 = math.tanh %92 : vector<8x32xf32>
    %94 = vector.extract_strided_slice %88 {offsets = [8, 0], sizes = [8, 32], strides = [1, 1]} : vector<16x32xf32> to vector<8x32xf32>
    %95 = arith.truncf %86 : vector<8x32xf32> to vector<8x32xbf16>
    %cst_34 = arith.constant dense<0.000000e+00> : vector<8x32xf32>
    %96 = tpu.matmul %95, %0, %cst_34 {dimension_numbers = #tpu.dot_dimension_numbers<[1], [0], [0], [1], [0, 0, 1, 1], [], []>} : vector<8x32xbf16>, vector<32x32xbf16>, vector<8x32xf32> -> vector<8x32xf32>
    %97 = arith.addf %94, %96 : vector<8x32xf32>
    %98 = math.tanh %97 : vector<8x32xf32>
    %99 = tpu.concatenate %93, %98 in 0 : vector<8x32xf32>, vector<8x32xf32> -> vector<16x32xf32>
    %100 = arith.truncf %99 : vector<16x32xf32> to vector<16x32xbf16>
    %c0_35 = arith.constant 0 : index
    %c0_36 = arith.constant 0 : index
    %101 = vector.load %arg3[%c0_35, %c0_36] : memref<32x32xbf16, #tpu.memory_space<vmem>>, vector<32x32xbf16>
    %cst_37 = arith.constant dense<0.000000e+00> : vector<16x32xf32>
    %102 = tpu.matmul %100, %101, %cst_37 {dimension_numbers = #tpu.dot_dimension_numbers<[1], [0], [0], [1], [0, 0, 1, 1], [], []>} : vector<16x32xbf16>, vector<32x32xbf16>, vector<16x32xf32> -> vector<16x32xf32>
    %c0_38 = arith.constant 0 : index
    %c0_39 = arith.constant 0 : index
    %103 = vector.load %arg4[%c0_38, %c0_39] : memref<1x32xf32, #tpu.memory_space<vmem>>, vector<1x32xf32>
    %104 = vector.broadcast %103 : vector<1x32xf32> to vector<16x32xf32>
    %105 = arith.addf %102, %104 : vector<16x32xf32>
    %cst_40 = arith.constant 0.000000e+00 : f32
    %106 = vector.broadcast %cst_40 : f32 to vector<16x32xf32>
    %107 = arith.maximumf %105, %106 : vector<16x32xf32>
    %108 = arith.truncf %107 : vector<16x32xf32> to vector<16x32xbf16>
    %c0_41 = arith.constant 0 : index
    %c0_42 = arith.constant 0 : index
    %109 = vector.load %arg5[%c0_41, %c0_42] : memref<32x128xbf16, #tpu.memory_space<vmem>>, vector<32x128xbf16>
    %cst_43 = arith.constant dense<0.000000e+00> : vector<16x128xf32>
    %110 = tpu.matmul %108, %109, %cst_43 {dimension_numbers = #tpu.dot_dimension_numbers<[1], [0], [0], [1], [0, 0, 1, 1], [], []>} : vector<16x32xbf16>, vector<32x128xbf16>, vector<16x128xf32> -> vector<16x128xf32>
    %c0_44 = arith.constant 0 : index
    %c0_45 = arith.constant 0 : index
    %111 = vector.load %arg6[%c0_44, %c0_45] : memref<1x128xf32, #tpu.memory_space<vmem>>, vector<1x128xf32>
    %112 = vector.broadcast %111 : vector<1x128xf32> to vector<16x128xf32>
    %113 = arith.addf %110, %112 : vector<16x128xf32>
    %c0_46 = arith.constant 0 : index
    %c0_47 = arith.constant 0 : index
    %114 = vector.load %arg7[%c0_46, %c0_47] : memref<16x128xf32, #tpu.memory_space<vmem>>, vector<16x128xf32>
    tpu.vector_store %arg7[%c0_46, %c0_47], %113 {strides = array<i32>} : memref<16x128xf32, #tpu.memory_space<vmem>>, vector<16x128xf32>,
    return
  }
  func.func @transform_0(%arg0: i32) -> (i32, i32, i32) {
    %c0_i32 = arith.constant 0 : i32
    %c0_i32_0 = arith.constant 0 : i32
    %c0_i32_1 = arith.constant 0 : i32
    return %c0_i32, %arg0, %c0_i32_0 : i32, i32, i32
  }
  func.func @transform_1(%arg0: i32) -> (i32, i32) {
    %c0_i32 = arith.constant 0 : i32
    %c0_i32_0 = arith.constant 0 : i32
    %c0_i32_1 = arith.constant 0 : i32
    return %c0_i32, %c0_i32_0 : i32, i32
  }
  func.func @transform_2(%arg0: i32) -> (i32, i32) {
    %c0_i32 = arith.constant 0 : i32
    %c0_i32_0 = arith.constant 0 : i32
    %c0_i32_1 = arith.constant 0 : i32
    return %c0_i32, %c0_i32_0 : i32, i32
  }
  func.func @transform_3(%arg0: i32) -> (i32, i32) {
    %c0_i32 = arith.constant 0 : i32
    %c0_i32_0 = arith.constant 0 : i32
    %c0_i32_1 = arith.constant 0 : i32
    return %c0_i32, %c0_i32_0 : i32, i32
  }
  func.func @transform_4(%arg0: i32) -> (i32, i32) {
    %c0_i32 = arith.constant 0 : i32
    %c0_i32_0 = arith.constant 0 : i32
    %c0_i32_1 = arith.constant 0 : i32
    return %c0_i32, %c0_i32_0 : i32, i32
  }
  func.func @transform_5(%arg0: i32) -> (i32, i32) {
    %c0_i32 = arith.constant 0 : i32
    %c0_i32_0 = arith.constant 0 : i32
    %c0_i32_1 = arith.constant 0 : i32
    return %c0_i32, %c0_i32_0 : i32, i32
  }
  func.func @transform_6(%arg0: i32) -> (i32, i32) {
    %c0_i32 = arith.constant 0 : i32
    %c0_i32_0 = arith.constant 0 : i32
    return %arg0, %c0_i32 : i32, i32
  }
}

</mosaic_0001>

<bundles_post_ra>
// kernel: tpu_custom_call.1
= control target key start
LH: loop header
LB: loop body
LE: loop exit
PB: predicated region body
PF: predicated region fallthrough
CT: control target
= control target key end

     0   :  { %s2304_s0 = inlined_call_operand.hbm [shape: f32[8,32,32], index: 0, kind: input, shape index: {}]   ;;  %s2305_s1 = inlined_call_operand.hbm [shape: bf16[32,32], index: 1, kind: input, shape index: {}]   ;;  %s2306_s2 = inlined_call_operand.hbm [shape: bf16[32,32], index: 2, kind: input, shape index: {}]   ;;  %s2307_s3 = inlined_call_operand.vmem [shape: f32[1,32], index: 3, kind: input, shape index: {}]   ;;  %s2308_s4 = inlined_call_operand.hbm [shape: bf16[32,128], index: 4, kind: input, shape index: {}]   ;;  %s2309_s5 = inlined_call_operand.vmem [shape: f32[1,128], index: 5, kind: input, shape index: {}]   ;;  %s2310_s6 = inlined_call_operand.hbm [shape: f32[32,128], index: 6, kind: output, shape index: {}]  }
   0x1   :  { %2319 = sst [smem:[#allocation21_spill]] %s2305_s1 }
   0x2   :  { %11 = vsyncpa [#allocation3], 0 }
   0x3   :  { %13 = vsyncpa [#allocation3 + $0x1], 0 }
   0x4   :  { %14 = vsyncpa [#allocation6], 0 }
   0x5   :  { %15 = vsyncpa [#allocation9], 0 }
   0x6   :  { %16 = vsyncpa [#allocation4], 0 }
   0x7   :  { %18 = vsyncpa [#allocation4 + $0x1], 0  ;;  %s1920_s21 = smov 0   ;;  %s1922_s22 = smov 0  }
   0x8   :  { %s1924_s23 = smov 0   ;;  %s1926_s24 = smov 0  }
   0x9 LB: > { %s1941_s25 = sadd.s32 4294967295, %s1866_s24   ;;  %s1329_s26 = sadd.s32 4294967294, %s1866_s24   ;;  %s1866_s24 = sphi %s1926_s24, %s2341_s24   ;;  %s1862_s23 = sphi %s1924_s23, %s2345_s23   ;;  %s1858_s22 = sphi %s1922_s22, %s2344_s22   ;;  %s1854_s21 = sphi %s1920_s21, %s2343_s21  }
   0xa   : > { %s1945_s27 = sadd.s32 1, %s1866_s24   ;;  %s31_s28 = sadd.s32 1, %s1862_s23 }
   0xb   : > { %2320 = sst [smem:[#allocation18_spill]] %s1945_s27  ;;  %s28_s29 = ssub.s32 %s1866_s24, %s1945_s27 }
   0xc   : > { %p38_p0 = scmp.ne.s32.totalorder %s1862_s23, %s1858_s22  ;;  %p29_p1 = scmp.eq.s32.totalorder %s28_s29, 0 }
   0xd   : > { %p39_p2 = scmp.eq.s32.totalorder %s1866_s24, 0  ;;  %p44_p3 = scmp.ne.s32.totalorder %s1858_s22, %s1854_s21 }
   0xe   : > { %p2311_p4 = scmp.eq.s32.totalorder %s1941_s25, 0  ;;  %p173_p7 = scmp.eq.s32.totalorder %s1941_s25, 1 }
   0xf   : > { %s1957_s30 = scalar_select %p29_p1, %s1862_s23, %s31_s28  }
  0x10   : > { %p1959_p5 = por %p39_p2, %p38_p0  ;;  %p1965_p6 = por %p2311_p4, %p44_p3 }
  0x11   : > { %2321 = sst [smem:[#allocation19_spill]] %s1957_s30  ;;  %p179_p8 = scmp.eq.s32.totalorder %s1329_s26, 1 }
  0x12   : > { %s2322_s7 = scalar_select %p1959_p5, 1, 0 }
  0x13   : > { %s2323_s8 = scalar_select %p1965_p6, 1, 0 }
  0x14   : > { %p1330_p9 = scmp.ge.s32.totalorder %s1866_s24, 1  ;;  %p186_p10 = scmp.lt.s32.totalorder %s1866_s24, 3 }
  0x15   : > { %p1972_p11 = por %p173_p7, %p38_p0  ;;  %p1976_p12 = por %p179_p8, %p44_p3 }
  0x16   : > { %p1980_p13 = pnand %p1330_p9, %p186_p10  ;;  %s1868_s12 = smov [#allocation5]  }
  0x17   : > { %s2324_s9 = scalar_select %p1972_p11, 1, 0 }
  0x18   : > { %s2325_s10 = scalar_select %p1976_p12, 1, 0 }
  0x19   : > { %s2327_s11 = scalar_select %p1980_p13, 1, 0 }
  0x1a   : > { %2326 = sst [smem:[#allocation20_spill]] %s2325_s10  ;;  %p1601_p1 = pneg %p1980_p13 }
  0x1b   : > { %s198_s13 = sshll.u32 %s1868_s12, 4  ;;  %s1869_s15 = smov [#allocation7]   ;;  %s199_s13 = int_to_ptr.vmem [resolvable:$true] %s198_s13 }
  0x1c   : > { %p1988_p2 = pnand %p1601_p1, %p2311_p4  ;;  %s211_s16 = sshll.u32 %s1869_s15, 4  ;;  %s1992_s16 = int_to_ptr.vmem [resolvable:$true] %s211_s16 }
  0x1d   : > { %s2329_s1 = sld [smem:[#allocation21_spill]] }
  0x1e   : > { %p2002_p3 = pneg %p1988_p2 }
  0x23   : > { %s1708_s19 = scalar_lea.hbm %s2329_s1, 256 }
  0x24   : > { %p1709_p0 = scmp.ne.s32.totalorder %s2329_s1, %s1708_s19  ;;  %p1715_p9 = scmp.lt.u32.totalorder %s1708_s19, %s2329_s1 }
  0x26   : > { %p1711_p7 = pnand %p2002_p3, %p1709_p0 }
  0x28   : > { %p1712_p8 = pneg %p1711_p7 }
  0x2a   : > { %p1717_p10 = pnand %p1715_p9, %p1712_p8 }
  0x2c   : > { %1720 = shalt.err (!%p1717_p10)
}
  0x2d   : > { %s1721_s15 = scalar_lea.vmem %s199_s13, 256  ;;  %p1729_p11 = scmp.lt.s32.totalorder %s199_s13, %s199_s13 }
  0x2e   : > { %p1722_p1 = scmp.ne.s32.totalorder %s199_s13, %s1721_s15  ;;  %p1730_p6 = scmp.lt.s32.totalorder %s1721_s15, %s1721_s15 }
  0x30   : > { %p1724_p4 = pnand %p1722_p1, %p2002_p3  ;;  %p1731_p13 = por %p1730_p6, %p1729_p11 }
  0x32   : > { %p1725_p12 = pneg %p1724_p4 }
  0x34   : > { %p1732_p5 = pnand %p1731_p13, %p1725_p12 }
  0x36   : > { %1735 = shalt.err (!%p1732_p5)
}
  0x37   : > { %s1870_s17 = smov 64   ;;  %s1871_s18 = smov 4  }
  0x38   : > { %1604 = dma.hbm_to_vmem [thread:$0]  (!%p1988_p2), %s2329_s1, 256, %s199_s13, [#allocation6], %s1870_s17, %s1870_s17, %s1871_s18  }
  0x39   : > { %s1736_s12 = scalar_lea.hbm %s2306_s2, 256 }
  0x3a   : > { %p1737_p4 = scmp.ne.s32.totalorder %s2306_s2, %s1736_s12  ;;  %p1743_p11 = scmp.lt.u32.totalorder %s1736_s12, %s2306_s2 }
  0x3c   : > { %p1739_p5 = pnand %p1737_p4, %p2002_p3 }
  0x3e   : > { %p1740_p6 = pneg %p1739_p5 }
  0x40   : > { %p1745_p12 = pnand %p1743_p11, %p1740_p6 }
  0x42   : > { %1748 = shalt.err (!%p1745_p12)
}
  0x43   : > { %s1749_s13 = scalar_lea.vmem %s1992_s16, 256  ;;  %p1757_p8 = scmp.lt.s32.totalorder %s1992_s16, %s1992_s16 }
  0x44   : > { %p1750_p13 = scmp.ne.s32.totalorder %s1992_s16, %s1749_s13  ;;  %p1758_p9 = scmp.lt.s32.totalorder %s1749_s13, %s1749_s13 }
  0x46   : > { %p1752_p0 = pnand %p1750_p13, %p2002_p3  ;;  %p1759_p10 = por %p1758_p9, %p1757_p8 }
  0x48   : > { %p1753_p7 = pneg %p1752_p0 }
  0x4a   : > { %p1760_p1 = pnand %p1759_p10, %p1753_p7 }
  0x4c   : > { %1763 = shalt.err (!%p1760_p1)
}
  0x4d   : > { %1607 = dma.hbm_to_vmem [thread:$0]  (!%p1988_p2), %s2306_s2, 256, %s1992_s16, [#allocation6], %s1870_s17, %s1870_s17, %s1871_s18  }
  0x4e   : > { %s1872_s10 = smov [#allocation8]   ;;  %s1764_s29 = scalar_lea.hbm %s2308_s4, 256 }
  0x4f   : > { %s227_s19 = sshll.u32 %s1872_s10, 4  ;;  %p1765_p4 = scmp.ne.s32.totalorder %s2308_s4, %s1764_s29  ;;  %s228_s19 = int_to_ptr.vmem [resolvable:$true] %s227_s19 }
  0x50   : > { %p1771_p11 = scmp.lt.u32.totalorder %s1764_s29, %s2308_s4 }
  0x51   : > { %p1767_p5 = pnand %p1765_p4, %p2002_p3 }
  0x53   : > { %p1768_p6 = pneg %p1767_p5 }
  0x55   : > { %p1773_p12 = pnand %p1771_p11, %p1768_p6 }
  0x57   : > { %1776 = shalt.err (!%p1773_p12)
}
  0x58   : > { %s1777_s16 = scalar_lea.vmem %s228_s19, 256  ;;  %p1785_p8 = scmp.lt.s32.totalorder %s228_s19, %s228_s19 }
  0x59   : > { %p1778_p13 = scmp.ne.s32.totalorder %s228_s19, %s1777_s16  ;;  %p1786_p9 = scmp.lt.s32.totalorder %s1777_s16, %s1777_s16 }
  0x5b   : > { %p1780_p0 = pnand %p1778_p13, %p2002_p3  ;;  %p1787_p10 = por %p1786_p9, %p1785_p8 }
  0x5d   : > { %p1781_p7 = pneg %p1780_p0 }
  0x5f   : > { %p1788_p1 = pnand %p1787_p10, %p1781_p7 }
  0x61   : > { %1791 = shalt.err (!%p1788_p1)
}
  0x62   : > { %1610 = dma.hbm_to_vmem [thread:$0]  (!%p1988_p2), %s2308_s4, 256, %s228_s19, [#allocation9], %s1870_s17, %s1870_s17, %s1871_s18  }
  0x63   : > { %p1334_p4 = scmp.ge.s32.totalorder %s1866_s24, 2 }
  0x65   : > { %240 = sbr.rel (%p1334_p4) target bundleno = 123 (0x7b), region = 36 }
  0x6c   : > { %s244_s28 = sand.u32 1, %s1862_s23   ;;  %s1389_s14 = sshll.u32 %s1866_s24, 8 }
  0x6d   : > { %s1335_s30 = sshll.u32 %s244_s28, 7  ;;  %s254_s17 = scalar_lea.hbm %s2304_s0, %s1389_s14 }
  0x6e   : > { %p2331_p2 = scmp.ne.s32.totalorder %s2322_s7, 0  ;;  %s248_s19 = scalar_lea.vmem [#allocation2], %s1335_s30 }
  0x6f   : > { %s267_s26 = sshll.u32 %s248_s19, 4  ;;  %s1873_s12 = smov 512   ;;  %s268_s26 = int_to_ptr.vmem [resolvable:$true] %s267_s26 }
  0x70   : > { %s1584_s18 = scalar_select %p2331_p2, [#allocation0], [#allocation13] }
  0x71   : > { %1585 = sst [smem:[#allocation12]] (%p2331_p2), %s1873_s12  ;;  %s1874_s15 = smov 256  }
  0x72   : > { %s259_s29 = sld [smem:[%s1584_s18]]   ;;  %s1875_s13 = smov 2  }
  0x73   : > { %1586 = sst [smem:[#allocation12 + $0x1]] (%p2331_p2), %s1874_s15  ;;  %s1876_s16 = smov 128  }
  0x74   : > { %1587 = sst [smem:[#allocation12 + $0x2]] (%p2331_p2), %s1875_s13  ;;  %s1877_s27 = smov 8  }
  0x75   : > { %1588 = sst [smem:[#allocation12 + $0x3]] (%p2331_p2), %s1876_s16  ;;  %s245_s30 = scalar_lea.sflag [#allocation3], %s244_s28 }
  0x76   : > { %1589 = sst [smem:[#allocation12 + $0x4]] (%p2331_p2), %s1876_s16  ;;  %s1878_s10 = smov [#allocation11]  }
  0x77   : > { %1590 = sst [smem:[#allocation12 + $0x5]] (%p2331_p2), %s1877_s27 }
  0x78   : > { %s1338_s1 = sshll.u32 %s259_s29, 26 }
  0x79   : > { %s1339_s14 = sadd.s32 134217728, %s1338_s1 }
  0x7a   : > { %1591 = dma.general (%p2331_p2), %s254_s17, 2048, %s268_s26, %s245_s30, %s1878_s10, [#allocation12], %s1339_s14, 0  }
  0x7b PF: > { %p2332_p3 = scmp.ne.s32.totalorder %s2327_s11, 0 }
  0x7c   : > { %s2095_s20 = sand.u32 (!%p2332_p3), 1, %s1858_s22   ;;  %p2333_p5 = scmp.ne.s32.totalorder (!%p2332_p3), %s2323_s8, 0 }
  0x7d   : > { %292 = sbr.rel (%p2332_p3) target bundleno = 2417 (0x971), region = 44  ;;  %s1341_s18 = sshll.u32 (!%p2332_p3), %s2095_s20, 7 }
  0x7e   : > { %s295_s19 = scalar_lea.sflag (!%p2332_p3), [#allocation3], %s2095_s20  ;;  %s2099_s29 = scalar_lea.vmem (!%p2332_p3), [#allocation2], %s1341_s18 }
  0x84   : > { %1837 = dma.done.wait (%p2333_p5), %s295_s19, 2048  }
  0x85   : > { %1839 = vsyncadd (%p2333_p5), %s295_s19, 4294965248  ;;  %p2334_p6 = scmp.eq.s32.totalorder %s1941_s25, 0 }
  0x87   : > { %1841 = dma.done.wait (%p2334_p6), [#allocation6], 512   ;;  %p2335_p11 = pmov %p2334_p6 }
  0x88   : > { %p2336_p12 = pmov %p2334_p6 }
  0x89   : > { %1843 = vsyncadd (%p2335_p11), [#allocation6], 4294966784 }
  0x8a   : > { %1845 = dma.done.wait (%p2336_p12), [#allocation9], 256   ;;  %p2337_p13 = pmov %p2334_p6 }
  0x8b   : > { %v1879_v0 = vmov 0.0   ;;  %vm1880_vm0 = vmmov 0   ;;  %v2119_v1 = vld [vmem:[#allocation5] sm:$0xff]   ;;  %v2122_v2 = vld [vmem:[#allocation5 + $0x8] sm:$0xff]   ;;  %v1881_v3 = vmov 0   ;;  %vm360_vm1 = vcmask 261120  }
  0x8c   : > { %1847 = vsyncadd (%p2337_p13), [#allocation9], 4294967040  ;;  %1442 = vmatprep.subr.bf16.mxu0 %v1879_v0  ;;  %1446 = vmatprep.mubr.msk.bf16.mxu0 %vm1880_vm0, %v1879_v0  ;;  %v346_v4 = vld [vmem:[%s2099_s29] sm:$0xff]  ;;  %v347_v5 = vld [vmem:[%s2099_s29 + $0x8] sm:$0xff]  ;;  %s1345_s11 = sshll.u32 %s2095_s20, 4  ;;  %s1390_s15 = sshll.u32 %s1941_s25, 8 }
  0x8d   : > { %1450 = vmatprep.subr.bf16.mxu1 %v1879_v0  ;;  %1454 = vmatprep.mubr.msk.bf16.mxu1 %vm1880_vm0, %v1879_v0  ;;  %v1348_v16 = vld [vmem:[%s2099_s29 + $0x10] sm:$0xff]  ;;  %v1349_v17 = vld [vmem:[%s2099_s29 + $0x18] sm:$0xff]  ;;  %v1352_v32 = vld [vmem:[%s2099_s29 + $0x20] sm:$0xff]  ;;  %s338_s26 = scalar_lea.vmem [#allocation10], %s1345_s11  ;;  %s2260_s1 = scalar_lea.hbm %s2310_s6, %s1390_s15 }
  0x8e   : > { %1443 = vmatpush3.bf16.msra.mxu0 %v2119_v1  ;;  %1451 = vmatpush3.bf16.msra.mxu1 %v2119_v1  ;;  %v1353_v33 = vld [vmem:[%s2099_s29 + $0x28] sm:$0xff]  ;;  %v1356_v48 = vld [vmem:[%s2099_s29 + $0x30] sm:$0xff]  ;;  %v1357_v49 = vld [vmem:[%s2099_s29 + $0x38] sm:$0xff]  ;;  %s1227_s12 = sshll.u32 %s338_s26, 4  ;;  %s1214_s27 = scalar_lea.sflag [#allocation4], %s2095_s20  ;;  %s2255_s12 = int_to_ptr.vmem [resolvable:$true] %s1227_s12 }
  0x8f   : > { %1444 = vmatprep.subr.bf16.mxu0 %v1879_v0  ;;  %1452 = vmatprep.subr.bf16.mxu1 %v1879_v0  ;;  %s1792_s25 = scalar_lea.vmem %s2255_s12, 256  ;;  %p2338_p7 = scmp.ne.s32.totalorder %s2324_s9, 0 }
  0x90   : > { %p1793_p0 = scmp.ne.s32.totalorder %s2255_s12, %s1792_s25  ;;  %s1882_s14 = smov [#allocation10]  }
  0x91   : > { %s1796_s30 = sshll.u32 %s1882_s14, 4  ;;  %s1797_s30 = int_to_ptr.vmem [resolvable:$false] %s1796_s30 }
  0x92   : > { %1445 = vmatpush3.bf16.msra.mxu0 %v2122_v2  ;;  %1453 = vmatpush3.bf16.msra.mxu1 %v2122_v2  ;;  %p1794_p8 = pnand %p1793_p0, %p2338_p7  ;;  %s1798_s10 = scalar_lea.vmem %s1797_s30, 512 }
  0x93   : > { %1458 = vmatprep.subr.bf16.mxu0 %v1879_v0  ;;  %1466 = vmatprep.subr.bf16.mxu1 %v1879_v0  ;;  %p1799_p10 = scmp.lt.s32.totalorder %s2255_s12, %s1797_s30  ;;  %p1800_p1 = scmp.lt.s32.totalorder %s1798_s10, %s1792_s25 }
  0x94   : > { %p1795_p9 = pneg %p1794_p8 }
  0x95   : > { %1447 = vmatmul.mubr.bf16.vlgmr.msra.gmra.mrb[0].mxu0 %v1881_v3  ;;  %v1360_v3 = vld [vmem:[%s2099_s29 + $0x40] sm:$0xff]  ;;  %p1801_p2 = por %p1800_p1, %p1799_p10 }
  0x96   : > { %1459 = vmatpush3.bf16.msra.mxu0 %v2119_v1  ;;  %1462 = vmatprep.mubr.msk.bf16.mxu0 %vm1880_vm0, %v1879_v0 }
  0x97   : > { %1460 = vmatprep.subr.bf16.mxu0 %v1879_v0  ;;  %p1802_p3 = pnand %p1801_p2, %p1795_p9 }
  0x9a   : > { %1461 = vmatpush3.bf16.msra.mxu0 %v2122_v2 }
  0x9b   : > { %1474 = vmatprep.subr.bf16.mxu0 %v1879_v0 }
 0x168   : > { %v398_v6 = vpop.f32.mrb[0].mxu0 }
 0x169   : > { %v404_v7 = vadd.f32 %v398_v6, %v346_v4  ;;  %v406_v8 = vadd.f32 %v398_v6, %v347_v5  ;;  %v1448_v9 = vpop.f32.mrb[1].mxu0  ;;  %v1361_v4 = vld [vmem:[%s2099_s29 + $0x48] sm:$0xff] }
 0x16a   : > { %v401_v10 = vpop.f32.mrb[2].mxu0 }
 0x16b   : > { %1676 = vtanh.f32 %v404_v7  ;;  %v1449_v11 = vpop.f32.mrb[3].mxu0 }
 0x16c   : > { %1678 = vtanh.f32 %v406_v8 }
 0x175   : > { %v1677_v12 = vpop.eup %1676 }
 0x176   : > { %v1679_v13 = vpop.eup %1678  ;;  %v411_v14 = vpack.c.bf16 %v1677_v12, %v1677_v12 }
 0x177   : > { %v457_v15 = vpack.c.bf16 %v1679_v13, %v1679_v13 }
 0x178   : > { %1455 = vmatmul.mubr.msk.bf16.vlgmr.msra.gmra.mrb[0].mxu1 %vm360_vm1, %v411_v14 }
 0x179   : > { %1463 = vmatmul.mubr.msk.bf16.vlgmr.msra.gmra.mrb[4].mxu0 %vm360_vm1, %v457_v15  ;;  %1467 = vmatpush3.bf16.msra.mxu1 %v2119_v1 }
 0x17a   : > { %1475 = vmatpush3.bf16.msra.mxu0 %v2119_v1  ;;  %1468 = vmatprep.subr.bf16.mxu1 %v1879_v0 }
 0x17b   : > { %1476 = vmatprep.subr.bf16.mxu0 %v1879_v0  ;;  %1470 = vmatprep.mubr.msk.bf16.mxu1 %vm1880_vm0, %v1879_v0 }
 0x17c   : > { %1478 = vmatprep.mubr.msk.bf16.mxu0 %vm1880_vm0, %v1879_v0 }
 0x17d   : > { %1469 = vmatpush3.bf16.msra.mxu1 %v2122_v2 }
 0x17e   : > { %1477 = vmatpush3.bf16.msra.mxu0 %v2122_v2  ;;  %1482 = vmatprep.subr.bf16.mxu1 %v1879_v0 }
 0x17f   : > { %1490 = vmatprep.subr.bf16.mxu0 %v1879_v0 }
 0x24b   : > { %v449_v18 = vpop.f32.mrb[0].mxu1 }
 0x24c   : > { %v455_v19 = vadd.f32 %v1348_v16, %v449_v18  ;;  %v495_v20 = vpop.f32.mrb[4].mxu0  ;;  %v1456_v21 = vpop.f32.mrb[1].mxu1 }
 0x24d   : > { %v501_v22 = vadd.f32 %v1349_v17, %v495_v20  ;;  %v1464_v23 = vpop.f32.mrb[5].mxu0  ;;  %v452_v24 = vpop.f32.mrb[2].mxu1  ;;  %v1365_v20 = vld [vmem:[%s2099_s29 + $0x58] sm:$0xff] }
 0x24e   : > { %1680 = vtanh.f32 %v455_v19  ;;  %v498_v25 = vpop.f32.mrb[6].mxu0  ;;  %v1457_v26 = vpop.f32.mrb[3].mxu1  ;;  %v1364_v19 = vld [vmem:[%s2099_s29 + $0x50] sm:$0xff] }
 0x24f   : > { %1682 = vtanh.f32 %v501_v22  ;;  %v1465_v27 = vpop.f32.mrb[7].mxu0 }
 0x258   : > { %v1681_v28 = vpop.eup %1680 }
 0x259   : > { %v1683_v29 = vpop.eup %1682  ;;  %v506_v30 = vpack.c.bf16 %v1681_v28, %v1681_v28 }
 0x25a   : > { %v552_v31 = vpack.c.bf16 %v1683_v29, %v1683_v29 }
 0x25b   : > { %1471 = vmatmul.mubr.msk.bf16.vlgmr.msra.gmra.mrb[4].mxu1 %vm360_vm1, %v506_v30 }
 0x25c   : > { %1479 = vmatmul.mubr.msk.bf16.vlgmr.msra.gmra.mrb[8].mxu0 %vm360_vm1, %v552_v31  ;;  %1483 = vmatpush3.bf16.msra.mxu1 %v2119_v1 }
 0x25d   : > { %1491 = vmatpush3.bf16.msra.mxu0 %v2119_v1  ;;  %1484 = vmatprep.subr.bf16.mxu1 %v1879_v0 }
 0x25e   : > { %1492 = vmatprep.subr.bf16.mxu0 %v1879_v0  ;;  %1486 = vmatprep.mubr.msk.bf16.mxu1 %vm1880_vm0, %v1879_v0 }
 0x25f   : > { %1494 = vmatprep.mubr.msk.bf16.mxu0 %vm1880_vm0, %v1879_v0 }
 0x260   : > { %1485 = vmatpush3.bf16.msra.mxu1 %v2122_v2 }
 0x261   : > { %1493 = vmatpush3.bf16.msra.mxu0 %v2122_v2  ;;  %1498 = vmatprep.subr.bf16.mxu1 %v1879_v0 }
 0x262   : > { %1506 = vmatprep.subr.bf16.mxu0 %v1879_v0 }
 0x32e   : > { %v544_v34 = vpop.f32.mrb[4].mxu1 }
 0x32f   : > { %v550_v35 = vadd.f32 %v1352_v32, %v544_v34  ;;  %v590_v36 = vpop.f32.mrb[8].mxu0  ;;  %v1472_v37 = vpop.f32.mrb[5].mxu1 }
 0x330   : > { %v596_v38 = vadd.f32 %v1353_v33, %v590_v36  ;;  %v1480_v39 = vpop.f32.mrb[9].mxu0  ;;  %v547_v40 = vpop.f32.mrb[6].mxu1 }
 0x331   : > { %1684 = vtanh.f32 %v550_v35  ;;  %v593_v41 = vpop.f32.mrb[10].mxu0  ;;  %v1473_v42 = vpop.f32.mrb[7].mxu1  ;;  %v1368_v35 = vld [vmem:[%s2099_s29 + $0x60] sm:$0xff] }
 0x332   : > { %1686 = vtanh.f32 %v596_v38  ;;  %v1481_v43 = vpop.f32.mrb[11].mxu0 }
 0x33b   : > { %v1685_v44 = vpop.eup %1684 }
 0x33c   : > { %v1687_v45 = vpop.eup %1686  ;;  %v601_v46 = vpack.c.bf16 %v1685_v44, %v1685_v44 }
 0x33d   : > { %v647_v47 = vpack.c.bf16 %v1687_v45, %v1687_v45 }
 0x33e   : > { %1487 = vmatmul.mubr.msk.bf16.vlgmr.msra.gmra.mrb[8].mxu1 %vm360_vm1, %v601_v46 }
 0x33f   : > { %1495 = vmatmul.mubr.msk.bf16.vlgmr.msra.gmra.mrb[12].mxu0 %vm360_vm1, %v647_v47  ;;  %1499 = vmatpush3.bf16.msra.mxu1 %v2119_v1 }
 0x340   : > { %1507 = vmatpush3.bf16.msra.mxu0 %v2119_v1  ;;  %1500 = vmatprep.subr.bf16.mxu1 %v1879_v0 }
 0x341   : > { %1508 = vmatprep.subr.bf16.mxu0 %v1879_v0  ;;  %1502 = vmatprep.mubr.msk.bf16.mxu1 %vm1880_vm0, %v1879_v0 }
 0x342   : > { %1510 = vmatprep.mubr.msk.bf16.mxu0 %vm1880_vm0, %v1879_v0 }
 0x343   : > { %1501 = vmatpush3.bf16.msra.mxu1 %v2122_v2 }
 0x344   : > { %1509 = vmatpush3.bf16.msra.mxu0 %v2122_v2  ;;  %1514 = vmatprep.subr.bf16.mxu1 %v1879_v0 }
 0x345   : > { %1522 = vmatprep.subr.bf16.mxu0 %v1879_v0 }
 0x411   : > { %v639_v50 = vpop.f32.mrb[8].mxu1 }
 0x412   : > { %v645_v51 = vadd.f32 %v1356_v48, %v639_v50  ;;  %v685_v52 = vpop.f32.mrb[12].mxu0  ;;  %v1488_v53 = vpop.f32.mrb[9].mxu1  ;;  %v1673_v50 = vld [vmem:[#allocation7 + $0x8] sm:$0xff]  }
 0x413   : > { %v691_v54 = vadd.f32 %v1357_v49, %v685_v52  ;;  %v1496_v55 = vpop.f32.mrb[13].mxu0  ;;  %v642_v56 = vpop.f32.mrb[10].mxu1  ;;  %v1672_v49 = vld [vmem:[#allocation7] sm:$0xff]   ;;  %v1373_v52 = vld [vmem:[%s2099_s29 + $0x78] sm:$0xff] }
 0x414   : > { %1688 = vtanh.f32 %v645_v51  ;;  %v688_v57 = vpop.f32.mrb[14].mxu0  ;;  %v1489_v58 = vpop.f32.mrb[11].mxu1  ;;  %v1372_v51 = vld [vmem:[%s2099_s29 + $0x70] sm:$0xff] }
 0x415   : > { %1690 = vtanh.f32 %v691_v54  ;;  %v1497_v59 = vpop.f32.mrb[15].mxu0 }
 0x41e   : > { %v1689_v60 = vpop.eup %1688 }
 0x41f   : > { %v1691_v61 = vpop.eup %1690  ;;  %v696_v62 = vpack.c.bf16 %v1689_v60, %v1689_v60 }
 0x420   : > { %v742_v63 = vpack.c.bf16 %v1691_v61, %v1691_v61 }
 0x421   : > { %1503 = vmatmul.mubr.msk.bf16.vlgmr.msra.gmra.mrb[12].mxu1 %vm360_vm1, %v696_v62 }
 0x422   : > { %1511 = vmatmul.mubr.msk.bf16.vlgmr.msra.gmra.mrb[16].mxu0 %vm360_vm1, %v742_v63  ;;  %1515 = vmatpush3.bf16.msra.mxu1 %v2119_v1 }
 0x423   : > { %1523 = vmatpush3.bf16.msra.mxu0 %v2119_v1  ;;  %1516 = vmatprep.subr.bf16.mxu1 %v1879_v0 }
 0x424   : > { %1524 = vmatprep.subr.bf16.mxu0 %v1879_v0  ;;  %1518 = vmatprep.mubr.msk.bf16.mxu1 %vm1880_vm0, %v1879_v0 }
 0x425   : > { %1526 = vmatprep.mubr.msk.bf16.mxu0 %vm1880_vm0, %v1879_v0 }
 0x426   : > { %1517 = vmatpush3.bf16.msra.mxu1 %v2122_v2 }
 0x427   : > { %1525 = vmatpush3.bf16.msra.mxu0 %v2122_v2  ;;  %1530 = vmatprep.subr.bf16.mxu1 %v1879_v0 }
 0x428   : > { %1538 = vmatprep.subr.bf16.mxu0 %v1879_v0 }
 0x4f4   : > { %v734_v5 = vpop.f32.mrb[12].mxu1 }
 0x4f5   : > { %v740_v6 = vadd.f32 %v1360_v3, %v734_v5  ;;  %v780_v7 = vpop.f32.mrb[16].mxu0  ;;  %v1504_v8 = vpop.f32.mrb[13].mxu1  ;;  %v1674_v5 = vld [vmem:[#allocation8] sm:$0xff]  }
 0x4f6   : > { %v786_v9 = vadd.f32 %v1361_v4, %v780_v7  ;;  %v1512_v10 = vpop.f32.mrb[17].mxu0  ;;  %v737_v11 = vpop.f32.mrb[14].mxu1  ;;  %v1376_v7 = vld [vmem:[%s2307_s3] ss:$0 sm:$0xff] }
 0x4f7   : > { %1692 = vtanh.f32 %v740_v6  ;;  %v783_v12 = vpop.f32.mrb[18].mxu0  ;;  %v1505_v13 = vpop.f32.mrb[15].mxu1  ;;  %v1675_v6 = vld [vmem:[#allocation8 + $0x8] sm:$0xff]  }
 0x4f8   : > { %1694 = vtanh.f32 %v786_v9  ;;  %v1513_v14 = vpop.f32.mrb[19].mxu0 }
 0x501   : > { %v1693_v15 = vpop.eup %1692 }
 0x502   : > { %v1695_v16 = vpop.eup %1694  ;;  %v791_v17 = vpack.c.bf16 %v1693_v15, %v1693_v15 }
 0x503   : > { %v837_v18 = vpack.c.bf16 %v1695_v16, %v1695_v16 }
 0x504   : > { %1519 = vmatmul.mubr.msk.bf16.vlgmr.msra.gmra.mrb[16].mxu1 %vm360_vm1, %v791_v17 }
 0x505   : > { %1527 = vmatmul.mubr.msk.bf16.vlgmr.msra.gmra.mrb[20].mxu0 %vm360_vm1, %v837_v18  ;;  %1531 = vmatpush3.bf16.msra.mxu1 %v2119_v1 }
 0x506   : > { %1539 = vmatpush3.bf16.msra.mxu0 %v2119_v1  ;;  %1532 = vmatprep.subr.bf16.mxu1 %v1879_v0 }
 0x507   : > { %1540 = vmatprep.subr.bf16.mxu0 %v1879_v0  ;;  %1534 = vmatprep.mubr.msk.bf16.mxu1 %vm1880_vm0, %v1879_v0 }
 0x508   : > { %1542 = vmatprep.mubr.msk.bf16.mxu0 %vm1880_vm0, %v1879_v0 }
 0x509   : > { %1533 = vmatpush3.bf16.msra.mxu1 %v2122_v2 }
 0x50a   : > { %1541 = vmatpush3.bf16.msra.mxu0 %v2122_v2  ;;  %1546 = vmatprep.subr.bf16.mxu1 %v1879_v0 }
 0x50b   : > { %1554 = vmatprep.subr.bf16.mxu0 %v1879_v0 }
 0x5d7   : > { %v829_v21 = vpop.f32.mrb[16].mxu1 }
 0x5d8   : > { %v835_v22 = vadd.f32 %v1364_v19, %v829_v21  ;;  %v875_v23 = vpop.f32.mrb[20].mxu0  ;;  %v1520_v24 = vpop.f32.mrb[17].mxu1 }
 0x5d9   : > { %v881_v25 = vadd.f32 %v1365_v20, %v875_v23  ;;  %v1528_v26 = vpop.f32.mrb[21].mxu0  ;;  %v832_v27 = vpop.f32.mrb[18].mxu1 }
 0x5da   : > { %1696 = vtanh.f32 %v835_v22  ;;  %v878_v28 = vpop.f32.mrb[22].mxu0  ;;  %v1521_v29 = vpop.f32.mrb[19].mxu1 }
 0x5db   : > { %1698 = vtanh.f32 %v881_v25  ;;  %v1529_v30 = vpop.f32.mrb[23].mxu0 }
 0x5e4   : > { %v1697_v31 = vpop.eup %1696 }
 0x5e5   : > { %v1699_v32 = vpop.eup %1698  ;;  %v886_v33 = vpack.c.bf16 %v1697_v31, %v1697_v31 }
 0x5e6   : > { %v932_v34 = vpack.c.bf16 %v1699_v32, %v1699_v32 }
 0x5e7   : > { %1535 = vmatmul.mubr.msk.bf16.vlgmr.msra.gmra.mrb[20].mxu1 %vm360_vm1, %v886_v33 }
 0x5e8   : > { %1543 = vmatmul.mubr.msk.bf16.vlgmr.msra.gmra.mrb[24].mxu0 %vm360_vm1, %v932_v34  ;;  %1547 = vmatpush3.bf16.msra.mxu1 %v2119_v1 }
 0x5e9   : > { %1555 = vmatpush3.bf16.msra.mxu0 %v2119_v1  ;;  %1548 = vmatprep.subr.bf16.mxu1 %v1879_v0  ;;  %v1369_v1 = vld [vmem:[%s2099_s29 + $0x68] sm:$0xff] }
 0x5ea   : > { %1556 = vmatprep.subr.bf16.mxu0 %v1879_v0  ;;  %1550 = vmatprep.mubr.msk.bf16.mxu1 %vm1880_vm0, %v1879_v0 }
 0x5eb   : > { %1558 = vmatprep.mubr.msk.bf16.mxu0 %vm1880_vm0, %v1879_v0 }
 0x5ec   : > { %1549 = vmatpush3.bf16.msra.mxu1 %v2122_v2 }
 0x5ed   : > { %1557 = vmatpush3.bf16.msra.mxu0 %v2122_v2  ;;  %1562 = vmatprep.subr.bf16.mxu1 %v1879_v0 }
 0x5ee   : > { %1570 = vmatprep.subr.bf16.mxu0 %v1879_v0 }
 0x6ba   : > { %v924_v36 = vpop.f32.mrb[20].mxu1 }
 0x6bb   : > { %v930_v37 = vadd.f32 %v1368_v35, %v924_v36  ;;  %v970_v38 = vpop.f32.mrb[24].mxu0  ;;  %v1536_v39 = vpop.f32.mrb[21].mxu1 }
 0x6bc   : > { %v976_v40 = vadd.f32 %v1369_v1, %v970_v38  ;;  %v1544_v41 = vpop.f32.mrb[25].mxu0  ;;  %v927_v42 = vpop.f32.mrb[22].mxu1 }
 0x6bd   : > { %1700 = vtanh.f32 %v930_v37  ;;  %v973_v43 = vpop.f32.mrb[26].mxu0  ;;  %v1537_v44 = vpop.f32.mrb[23].mxu1 }
 0x6be   : > { %1702 = vtanh.f32 %v976_v40  ;;  %v1545_v2 = vpop.f32.mrb[27].mxu0 }
 0x6c7   : > { %v1701_v45 = vpop.eup %1700 }
 0x6c8   : > { %v1703_v46 = vpop.eup %1702  ;;  %v981_v47 = vpack.c.bf16 %v1701_v45, %v1701_v45 }
 0x6c9   : > { %v1027_v48 = vpack.c.bf16 %v1703_v46, %v1703_v46 }
 0x6ca   : > { %1551 = vmatmul.mubr.msk.bf16.vlgmr.msra.gmra.mrb[24].mxu1 %vm360_vm1, %v981_v47 }
 0x6cb   : > { %1559 = vmatmul.mubr.msk.bf16.vlgmr.msra.gmra.mrb[28].mxu0 %vm360_vm1, %v1027_v48  ;;  %1566 = vmatprep.mubr.msk.bf16.mxu1 %vm1880_vm0, %v1879_v0 }
 0x6cc   : > { %1574 = vmatprep.mubr.msk.bf16.mxu0 %vm1880_vm0, %v1879_v0  ;;  %1563 = vmatpush3.bf16.msra.mxu1 %v1672_v49 }
 0x6cd   : > { %1564 = vmatprep.subr.bf16.mxu1 %v1879_v0  ;;  %1571 = vmatpush3.bf16.msra.mxu0 %v1674_v5 }
 0x6ce   : > { %1572 = vmatprep.subr.bf16.mxu0 %v1879_v0  ;;  %v1380_v0 = vld [vmem:[%s2309_s5] ss:$0 sm:$0xff] }
 0x6d0   : > { %1565 = vmatpush3.bf16.msra.mxu1 %v1673_v50 }
 0x6d1   : > { %1573 = vmatpush3.bf16.msra.mxu0 %v1675_v6 }
 0x79d   : > { %v1019_v53 = vpop.f32.mrb[24].mxu1 }
 0x79e   : > { %v1025_v54 = vadd.f32 %v1372_v51, %v1019_v53  ;;  %v1065_v55 = vpop.f32.mrb[28].mxu0  ;;  %v1552_v56 = vpop.f32.mrb[25].mxu1 }
 0x79f   : > { %v1071_v57 = vadd.f32 %v1373_v52, %v1065_v55  ;;  %v1560_v58 = vpop.f32.mrb[29].mxu0  ;;  %v1022_v59 = vpop.f32.mrb[26].mxu1 }
 0x7a0   : > { %1704 = vtanh.f32 %v1025_v54  ;;  %v1068_v60 = vpop.f32.mrb[30].mxu0  ;;  %v1553_v61 = vpop.f32.mrb[27].mxu1 }
 0x7a1   : > { %1706 = vtanh.f32 %v1071_v57  ;;  %v1561_v62 = vpop.f32.mrb[31].mxu0 }
 0x7aa   : > { %v1705_v63 = vpop.eup %1704 }
 0x7ab   : > { %v1707_v3 = vpop.eup %1706 }
 0x7ac   : > { %v1073_v4 = vpack.c.bf16 %v1707_v3, %v1705_v63 }
 0x7ae   : > { %1567 = vmatmul.mubr.msk.bf16.vlgmr.msra.gmra.mrb[28].mxu1 %vm360_vm1, %v1073_v4 }
 0x881   : > { %v1134_v8 = vpop.f32.mrb[28].mxu1 }
 0x882   : > { %v1135_v9 = vadd.f32 %v1376_v7, %v1134_v8  ;;  %v1568_v10 = vpop.f32.mrb[29].mxu1 }
 0x883   : > { %v1137_v11 = vpop.f32.mrb[30].mxu1 }
 0x884   : > { %v1138_v12 = vadd.f32 %v1376_v7, %v1137_v11  ;;  %v1569_v13 = vpop.f32.mrb[31].mxu1  ;;  %v1141_v14 = vmax.f32 %v1135_v9, 0.0 }
 0x886   : > { %v1142_v15 = vmax.f32 %v1138_v12, 0.0 }
 0x888   : > { %v1143_v16 = vpack.c.bf16 %v1142_v15, %v1141_v14 }
 0x88a   : > { %1575 = vmatmul.mubr.msk.bf16.vlgmr.msra.gmra.mrb[32].mxu0 %vm360_vm1, %v1143_v16 }
 0x95d   : > { %v1204_v17 = vpop.f32.mrb[32].mxu0 }
 0x95e   : > { %v1205_v18 = vadd.f32 %v1380_v0, %v1204_v17  ;;  %v1576_v19 = vpop.f32.mrb[33].mxu0 }
 0x95f   : > { %v1207_v20 = vpop.f32.mrb[34].mxu0 }
 0x960   : > { %1211 = vst [vmem:[%s338_s26] sm:$0xff] %v1205_v18  ;;  %v1208_v21 = vadd.f32 %v1380_v0, %v1207_v20  ;;  %v1577_v22 = vpop.f32.mrb[35].mxu0 }
 0x962   : > { %1212 = vst [vmem:[%s338_s26 + $0x8] sm:$0xff] %v1208_v21 }
 0x963   : > { %1805 = shalt.err (!%p1802_p3)
}
 0x964   : > { %s1806_s18 = scalar_lea.hbm %s2260_s1, 256  ;;  %s1810_s7 = scalar_lea.hbm %s2310_s6, 512 }
 0x965   : > { %p1807_p5 = scmp.ne.s32.totalorder %s2260_s1, %s1806_s18  ;;  %p1811_p12 = scmp.lt.u32.totalorder %s2260_s1, %s2310_s6 }
 0x966   : > { %p1812_p13 = scmp.lt.u32.totalorder %s1810_s7, %s1806_s18  ;;  %p1814_p8 = scmp.lt.u32.totalorder %s1806_s18, %s2260_s1 }
 0x967   : > { %p1808_p6 = pnand %p1807_p5, %p2338_p7 }
 0x968   : > { %p1813_p0 = por %p1812_p13, %p1811_p12 }
 0x969   : > { %p1809_p11 = pneg %p1808_p6 }
 0x96a   : > { %p1815_p9 = por %p1814_p8, %p1813_p0 }
 0x96c   : > { %p1816_p10 = pnand %p1815_p9, %p1809_p11 }
 0x96e   : > { %1819 = shalt.err (!%p1816_p10)
}
 0x96f   : > { %s1883_s28 = smov 128   ;;  %s1884_s17 = smov 8  }
 0x970   : > { %1599 = dma.vmem_to_hbm [thread:$0]  (%p2338_p7), %s2255_s12, 256, %s2260_s1, %s1214_s27, %s1883_s28, %s1883_s28, %s1884_s17  }
 0x971 PF: > { %s2339_s26 = sld [smem:[#allocation20_spill]]  ;;  %s1242_s15 = sand.u32 1, %s1854_s21  }
 0x972   : > { %s1243_s13 = scalar_lea.sflag [#allocation4], %s1242_s15 }
 0x977   : > { %p2340_p1 = scmp.ne.s32.totalorder %s2339_s26, 0 }
 0x979   : > { %p1612_p2 = pnand %p1334_p4, %p2340_p1 }
 0x97b   : > { %1849 = dma.done.wait (!%p1612_p2), %s1243_s13, 256  }
 0x97c   : > { %1851 = vsyncadd (!%p1612_p2), %s1243_s13, 4294967040  ;;  %s2341_s24 = sld [smem:[#allocation18_spill]]  ;;  %s2342_s16 = sld [smem:[#allocation19_spill]] }
 0x97d   : > { %s2343_s21 = smov %s1858_s22  ;;  %s2344_s22 = smov %s1862_s23 }
 0x982   : > { %p21_p3 = scmp.ge.s32.totalorder %s2341_s24, 4   ;;  %s2345_s23 = smov %s2342_s16 }
 0x984   :  { %23 = sbr.rel (!%p21_p3) target bundleno = 9 (0x9), region = 113 }
 0x98b   :  { %1248 = vsyncpa [#allocation3], 1 }
 0x98c   :  { %1250 = vsyncpa [#allocation3 + $0x1], 1 }
 0x98d   :  { %1251 = vsyncpa [#allocation6], 1 }
 0x98e   :  { %1252 = vsyncpa [#allocation9], 1 }
 0x98f   :  { %1253 = vsyncpa [#allocation4], 1 }
 0x990   :  { %1255 = vsyncpa [#allocation4 + $0x1], 1 }

</bundles_post_ra>
